<compile_context>
chip_gen: v7x
topology: tpu7x:2x2x1
jax: 0.10.0
libtpu: 0.0.40
codegen_flags: <defaults>
</compile_context>

<pallas_src>
import jax
import jax.numpy as jnp
import numpy as np
from jax.experimental import pallas as pl
from jax.experimental.pallas import tpu as pltpu


def gnn_kernel(a_ref, x_ref, w1t_ref, b1_ref, w2t_ref, b2_ref, w3_ref, b3_ref,
               out_ref):
    A = a_ref[...]                                                    # (N, N)
    X = x_ref[...]                                                    # (N, F)

    # --- GNN layer 1: aggregate then Linear(in_feats, hidden), relu ---
    # (A @ X) first: F < H so the N^2 matmul uses the smaller inner dim.
    agg1 = jnp.dot(A, X, preferred_element_type=jnp.float32)          # (N, F)
    h1 = jnp.dot(agg1, w1t_ref[...],
                 preferred_element_type=jnp.float32) + b1_ref[...]    # (N, H)
    h1 = jnp.maximum(h1, 0.0)

    # --- GNN layer 2: reassociated as A @ (h1 @ W2t) since C < H ---
    hw2 = jnp.dot(h1, w2t_ref[...],
                  preferred_element_type=jnp.float32)                 # (N, C)
    h2 = jnp.dot(A, hw2, preferred_element_type=jnp.float32) + b2_ref[...]  # (N, C)

    # --- readout: Linear(N, 1) over the node axis, emitted as a (1, C) row ---
    # w3 @ h2 == (h2^T @ w3^T)^T ; b3 is scalar-shaped so broadcasting matches.
    logits = jnp.dot(w3_ref[...], h2,
                     preferred_element_type=jnp.float32) + b3_ref[...]  # (1, C)
    out_ref[...] = jax.nn.sigmoid(logits)                             # lane-dense row store


def gnn_forward(adj, x, w1, b1, w2, b2, w3, b3):
    n = adj.shape[0]
    in_feats = x.shape[1]
    hidden = w1.shape[0]
    num_classes = w2.shape[0]

    # Pre-transpose the Linear weights OUTSIDE the kernel (cheap one-time XLA
    # transpose) so no XLU relayout happens inside the kernel.
    w1t = w1.T          # (F, H)
    w2t = w2.T          # (H, C)

    flops = 2 * (n * n * in_feats            # A @ X
                 + n * in_feats * hidden     # agg1 @ W1t
                 + n * hidden * num_classes  # h1 @ W2t
                 + n * n * num_classes       # A @ hw2
                 + n * num_classes)          # w3 @ h2
    bytes_accessed = 4 * (n * n + n * in_feats + in_feats * hidden + hidden
                          + hidden * num_classes + num_classes
                          + n + 1 + num_classes)

    vmem = pl.BlockSpec(memory_space=pltpu.MemorySpace.VMEM)
    row = pl.pallas_call(
        gnn_kernel,
        out_shape=jax.ShapeDtypeStruct((1, num_classes), jnp.float32),
        in_specs=[vmem] * 8,
        out_specs=vmem,
        cost_estimate=pl.CostEstimate(flops=flops,
                                      transcendentals=num_classes,
                                      bytes_accessed=bytes_accessed),
    )(adj, x, w1t, b1, w2t, b2, w3, b3)
    # Module returns shape (num_classes, 1); reshape outside the kernel.
    return row.reshape(num_classes, 1)


def reference_forward(adj, x, w1, b1, w2, b2, w3, b3):
    # Mirrors the PyTorch module op order exactly.
    h1 = jnp.maximum(adj @ x @ w1.T + b1, 0.0)
    h2 = adj @ h1 @ w2.T + b2
    return jax.nn.sigmoid(h2.T @ w3.T + b3)


if __name__ == "__main__":
    # Small shapes consistent with the module:
    #   N = num nodes = INUNITS (runtime_context.in_units), in_feats, hidden, num_classes
    N, IN_FEATS, HIDDEN, NUM_CLASSES = 8, 16, 32, 4

    key = jax.random.PRNGKey(0)
    k_adj, k_x, k_w1, k_b1, k_w2, k_b2, k_w3, k_b3 = jax.random.split(key, 8)

    # Graph: random directed edges + self loops; A[dst, src] = 1 for edge src->dst.
    rand_adj = (jax.random.uniform(k_adj, (N, N)) < 0.3).astype(jnp.float32)
    adj = jnp.minimum(rand_adj + jnp.eye(N, dtype=jnp.float32), 1.0)

    # Node features.
    x = jax.random.normal(k_x, (N, IN_FEATS), dtype=jnp.float32)

    # Deterministic parameter init (PyTorch Linear weight convention: (out, in)).
    w1 = jax.random.normal(k_w1, (HIDDEN, IN_FEATS), dtype=jnp.float32) * 0.1
    b1 = jax.random.normal(k_b1, (1, HIDDEN), dtype=jnp.float32) * 0.1
    w2 = jax.random.normal(k_w2, (NUM_CLASSES, HIDDEN), dtype=jnp.float32) * 0.1
    b2 = jax.random.normal(k_b2, (1, NUM_CLASSES), dtype=jnp.float32) * 0.1
    w3 = jax.random.normal(k_w3, (1, N), dtype=jnp.float32) * 0.1   # Linear(INUNITS=N, 1)
    b3 = jax.random.normal(k_b3, (1, 1), dtype=jnp.float32) * 0.1

    out = gnn_forward(adj, x, w1, b1, w2, b2, w3, b3)
    out = jax.block_until_ready(out)

    ref = reference_forward(adj, x, w1, b1, w2, b2, w3, b3)
    np.testing.assert_allclose(np.asarray(out), np.asarray(ref),
                               rtol=1e-5, atol=1e-5)
    assert out.shape == (NUM_CLASSES, 1)

    print("KERNEL_OK")
</pallas_src>

<mosaic_0001>
module attributes {stable_mosaic.version = 11 : i64} {
  func.func @gnn_kernel(%arg0: memref<8x8xf32, #tpu.memory_space<vmem>>, %arg1: memref<8x16xf32, #tpu.memory_space<vmem>>, %arg2: memref<16x32xf32, #tpu.memory_space<vmem>>, %arg3: memref<1x32xf32, #tpu.memory_space<vmem>>, %arg4: memref<32x4xf32, #tpu.memory_space<vmem>>, %arg5: memref<1x4xf32, #tpu.memory_space<vmem>>, %arg6: memref<1x8xf32, #tpu.memory_space<vmem>>, %arg7: memref<1x1xf32, #tpu.memory_space<vmem>>, %arg8: memref<1x4xf32, #tpu.memory_space<vmem>>) attributes {dimension_semantics = [], scalar_prefetch = 0 : i64, scratch_operands = 0 : i64, tpu.core_type = #tpu.core_type<tc>} {
    %c0 = arith.constant 0 : index
    %c0_0 = arith.constant 0 : index
    %0 = vector.load %arg0[%c0, %c0_0] : memref<8x8xf32, #tpu.memory_space<vmem>>, vector<8x8xf32>
    %c0_1 = arith.constant 0 : index
    %c0_2 = arith.constant 0 : index
    %1 = vector.load %arg1[%c0_1, %c0_2] : memref<8x16xf32, #tpu.memory_space<vmem>>, vector<8x16xf32>
    %cst = arith.constant dense<0.000000e+00> : vector<8x16xf32>
    %2 = tpu.matmul %0, %1, %cst {dimension_numbers = #tpu.dot_dimension_numbers<[1], [0], [0], [1], [0, 0, 1, 1], [], []>} : vector<8x8xf32>, vector<8x16xf32>, vector<8x16xf32> -> vector<8x16xf32>
    %c0_3 = arith.constant 0 : index
    %c0_4 = arith.constant 0 : index
    %3 = vector.load %arg2[%c0_3, %c0_4] : memref<16x32xf32, #tpu.memory_space<vmem>>, vector<16x32xf32>
    %cst_5 = arith.constant dense<0.000000e+00> : vector<8x32xf32>
    %4 = tpu.matmul %2, %3, %cst_5 {dimension_numbers = #tpu.dot_dimension_numbers<[1], [0], [0], [1], [0, 0, 1, 1], [], []>} : vector<8x16xf32>, vector<16x32xf32>, vector<8x32xf32> -> vector<8x32xf32>
    %c0_6 = arith.constant 0 : index
    %c0_7 = arith.constant 0 : index
    %5 = vector.load %arg3[%c0_6, %c0_7] : memref<1x32xf32, #tpu.memory_space<vmem>>, vector<1x32xf32>
    %6 = vector.broadcast %5 : vector<1x32xf32> to vector<8x32xf32>
    %7 = arith.addf %4, %6 : vector<8x32xf32>
    %cst_8 = arith.constant 0.000000e+00 : f32
    %8 = vector.broadcast %cst_8 : f32 to vector<8x32xf32>
    %9 = arith.maximumf %7, %8 : vector<8x32xf32>
    %c0_9 = arith.constant 0 : index
    %c0_10 = arith.constant 0 : index
    %10 = vector.load %arg4[%c0_9, %c0_10] : memref<32x4xf32, #tpu.memory_space<vmem>>, vector<32x4xf32>
    %cst_11 = arith.constant dense<0.000000e+00> : vector<8x4xf32>
    %11 = tpu.matmul %9, %10, %cst_11 {dimension_numbers = #tpu.dot_dimension_numbers<[1], [0], [0], [1], [0, 0, 1, 1], [], []>} : vector<8x32xf32>, vector<32x4xf32>, vector<8x4xf32> -> vector<8x4xf32>
    %cst_12 = arith.constant dense<0.000000e+00> : vector<8x4xf32>
    %12 = tpu.matmul %0, %11, %cst_12 {dimension_numbers = #tpu.dot_dimension_numbers<[1], [0], [0], [1], [0, 0, 1, 1], [], []>} : vector<8x8xf32>, vector<8x4xf32>, vector<8x4xf32> -> vector<8x4xf32>
    %c0_13 = arith.constant 0 : index
    %c0_14 = arith.constant 0 : index
    %13 = vector.load %arg5[%c0_13, %c0_14] : memref<1x4xf32, #tpu.memory_space<vmem>>, vector<1x4xf32>
    %14 = vector.broadcast %13 : vector<1x4xf32> to vector<8x4xf32>
    %15 = arith.addf %12, %14 : vector<8x4xf32>
    %c0_15 = arith.constant 0 : index
    %c0_16 = arith.constant 0 : index
    %16 = vector.load %arg6[%c0_15, %c0_16] : memref<1x8xf32, #tpu.memory_space<vmem>>, vector<1x8xf32>
    %cst_17 = arith.constant dense<0.000000e+00> : vector<1x4xf32>
    %17 = tpu.matmul %16, %15, %cst_17 {dimension_numbers = #tpu.dot_dimension_numbers<[1], [0], [0], [1], [0, 0, 1, 1], [], []>} : vector<1x8xf32>, vector<8x4xf32>, vector<1x4xf32> -> vector<1x4xf32>
    %c0_18 = arith.constant 0 : index
    %c0_19 = arith.constant 0 : index
    %18 = vector.load %arg7[%c0_18, %c0_19] : memref<1x1xf32, #tpu.memory_space<vmem>>, vector<1x1xf32>
    %19 = vector.broadcast %18 : vector<1x1xf32> to vector<1x4xf32>
    %20 = arith.addf %17, %19 : vector<1x4xf32>
    %21 = arith.negf %20 : vector<1x4xf32>
    %22 = math.exp %21 : vector<1x4xf32>
    %cst_20 = arith.constant 1.000000e+00 : f32
    %23 = vector.broadcast %cst_20 : f32 to vector<1x4xf32>
    %24 = arith.addf %23, %22 : vector<1x4xf32>
    %25 = arith.divf %23, %24 : vector<1x4xf32>
    %c0_21 = arith.constant 0 : index
    %c0_22 = arith.constant 0 : index
    %26 = vector.load %arg8[%c0_21, %c0_22] : memref<1x4xf32, #tpu.memory_space<vmem>>, vector<1x4xf32>
    tpu.vector_store %arg8[%c0_21, %c0_22], %25 {strides = array<i32>} : memref<1x4xf32, #tpu.memory_space<vmem>>, vector<1x4xf32>,
    return
  }
}

</mosaic_0001>

<bundles_post_ra>
// kernel: tpu_custom_call.1
= control target key start
LH: loop header
LB: loop body
LE: loop exit
PB: predicated region body
PF: predicated region fallthrough
CT: control target
= control target key end

     0   :  { %s657_s0 = inlined_call_operand.vmem [shape: f32[8,8], index: 0, kind: input, shape index: {}]   ;;  %s658_s1 = inlined_call_operand.vmem [shape: f32[8,16], index: 1, kind: input, shape index: {}]   ;;  %s659_s2 = inlined_call_operand.vmem [shape: f32[16,32], index: 2, kind: input, shape index: {}]   ;;  %s660_s3 = inlined_call_operand.vmem [shape: f32[1,32], index: 3, kind: input, shape index: {}]   ;;  %s661_s4 = inlined_call_operand.vmem [shape: f32[32,4], index: 4, kind: input, shape index: {}]   ;;  %s662_s5 = inlined_call_operand.vmem [shape: f32[1,4], index: 5, kind: input, shape index: {}]   ;;  %s663_s6 = inlined_call_operand.vmem [shape: f32[1,8], index: 6, kind: input, shape index: {}]   ;;  %s664_s7 = inlined_call_operand.<no memory space> [shape: f32[1,1], index: 7, kind: input, shape index: {}]   ;;  %s665_s8 = inlined_call_operand.hbm [shape: f32[1,4], index: 8, kind: output, shape index: {}]  }
   0x1   :  { %v13_v0 = vstv %s664_s7 }
   0x2   :  { %14 = vst [vmem:[#allocation2] sm:$0x1] %v13_v0 }
   0x3   :  { %v33_v1 = vld [vmem:[%s658_s1] sm:$0xff]  ;;  %vm34_vm0 = vcmask 64512   ;;  %v551_v3 = vmov 0.0   ;;  %vm552_vm1 = vmmov 0   ;;  %v109_v5 = vld [vmem:[%s659_s2 + $0x8] sm:$0xff] }
   0x4   :  { %v32_v2 = vld [vmem:[%s657_s0] sm:$0xff]  ;;  %475 = vmatprep.subr.mxu0 %v551_v3  ;;  %477 = vmatprep.mubr.msk.f32.mxu0 %vm552_vm1, %v551_v3 }
   0x5   :  { %v108_v4 = vld [vmem:[%s659_s2] sm:$0xff] }
   0x6   :  { %15 = vsyncpa [#allocation4], 0  ;;  %476 = vmatpush3.msra.mxu0 %v33_v1  ;;  %v553_v6 = vmov 0.0|0.0   ;;  %v509_v7 = vpack.c.bf16 %v109_v5, %v108_v4  ;;  %484 = vmatprep.mubr.msk.f32.mxu1 %vm552_vm1, %v551_v3  ;;  %v192_v8 = vld [vmem:[%s661_s4] sm:$0xff]  ;;  %v193_v9 = vld [vmem:[%s661_s4 + $0x8] sm:$0xff]  ;;  %vm117_vm2 = vcmask 130048   ;;  %v354_v30 = vlaneseq }
   0x7   :  { %508 = vmatprep.subr.bf16.mxu1 %v553_v6  ;;  %478 = vmatmul.mubr.msk.f32.vlgmr.msra.gmra.mrb[0].mxu0 %vm34_vm0, %v32_v2  ;;  %v512_v10 = vpack.c.bf16 %v193_v9, %v192_v8  ;;  %v194_v13 = vld [vmem:[%s661_s4 + $0x10] sm:$0xff]  ;;  %v195_v14 = vld [vmem:[%s661_s4 + $0x18] sm:$0xff]  ;;  %v454_v16 = vld [vmem:[%s660_s3] ss:$0 sm:$0xff]  ;;  %vm196_vm3 = vcmask 261120   ;;  %v554_v24 = vmov 0  }
   0x8   :  { %510 = vmatpush3.bf16.msra.mxu1 %v509_v7  ;;  %511 = vmatprep.subr.bf16.mxu0 %v553_v6  ;;  %v515_v15 = vpack.c.bf16 %v195_v14, %v194_v13  ;;  %v457_v25 = vld [vmem:[%s662_s5] ss:$0 sm:$0xff]  ;;  %v355_v31 = vshrl.u32 %v354_v30, 7  ;;  %s555_s5 = smov [#allocation3]   ;;  %vm437_vm4 = vcmask 24576  }
   0x9   :  { %495 = vmatprep.mubr.msk.f32.mxu0 %vm552_vm1, %v551_v3  ;;  %498 = vmatprep.subr.mxu1 %v551_v3  ;;  %v348_v23 = vld [vmem:[#allocation2] sm:$0x1]  ;;  %s445_s23 = sshll.u32 %s555_s5, 4  ;;  %s446_s23 = int_to_ptr.vmem [resolvable:$true] %s445_s23 }
   0xa   :  { %513 = vmatpush3.bf16.msra.mxu0 %v512_v10  ;;  %522 = vset.pattern.permute.xlu0 %v554_v24  ;;  %v347_v29 = vld [vmem:[%s663_s6] sm:$0x1]  ;;  %v356_v32 = vsub.s32 0, %v355_v31  ;;  %s527_s6 = scalar_lea.vmem %s446_s23, 16  ;;  %s531_s24 = scalar_lea.vmem %s446_s23, 32 }
   0xb   :  { %514 = vmatprep.subr.bf16.mxu0 %v553_v6  ;;  %351 = vperm.xlu0 %522, %v348_v23   ;;  %p528_p0 = scmp.ne.s32.totalorder %s446_s23, %s527_s6  ;;  %p532_p1 = scmp.lt.s32.totalorder %s446_s23, %s446_s23 }
   0xc   :  { %p533_p2 = scmp.lt.s32.totalorder %s531_s24, %s527_s6 }
   0xe   :  { %516 = vmatpush3.bf16.msra.mxu0 %v515_v15  ;;  %p534_p3 = por %p533_p2, %p532_p1 }
  0x10   :  { %p535_p4 = pnand %p534_p3, %p528_p0 }
  0x8a   :  { %v352_v33 = vpop.permute.xlu0 %351 }
  0x8b   :  { %v357_v34 = vrot.slane %v352_v33, %v356_v32 }
  0xda   :  { %v104_v11 = vpop.f32.mrb[0].mxu0 }
  0xdb   :  { %v479_v12 = vpop.f32.mrb[1].mxu0  ;;  %485 = vmatmul.mubr.msk.f32.vlgmr.msra.gmra.mrb[0].mxu1 %vm117_vm2, %v104_v11 }
  0xdc   :  { %500 = vmatprep.mubr.msk.f32.mxu1 %vm552_vm1, %v551_v3 }
 0x1ae   :  { %v187_v17 = vpop.f32.mrb[0].mxu1 }
 0x1af   :  { %v188_v18 = vadd.f32 %v454_v16, %v187_v17  ;;  %v486_v19 = vpop.f32.mrb[1].mxu1 }
 0x1b1   :  { %v191_v20 = vmax.f32 %v188_v18, 0.0 }
 0x1b3   :  { %496 = vmatmul.mubr.msk.f32.vlgmr.msra.gmra.mrb[2].mxu0 %vm196_vm3, %v191_v20 }
 0x286   :  { %v266_v21 = vpop.f32.mrb[2].mxu0 }
 0x287   :  { %v497_v22 = vpop.f32.mrb[3].mxu0  ;;  %499 = vmatpush3.msra.mxu1 %v266_v21 }
 0x288   :  { %501 = vmatmul.mubr.msk.f32.vlgmr.msra.gmra.mrb[2].mxu1 %vm34_vm0, %v32_v2  ;;  %503 = vmatprep.subr.mxu1 %v551_v3 }
 0x289   :  { %505 = vmatprep.mubr.msk.f32.mxu1 %vm552_vm1, %v551_v3 }
 0x35b   :  { %v343_v26 = vpop.f32.mrb[2].mxu1 }
 0x35c   :  { %v344_v27 = vadd.f32 %v457_v25, %v343_v26  ;;  %v502_v28 = vpop.f32.mrb[3].mxu1 }
 0x35e   :  { %504 = vmatpush3.msra.mxu1 %v344_v27 }
 0x35f   :  { %506 = vmatmul.mubr.msk.f32.vlgmr.msra.gmra.mrb[4].mxu1 %vm34_vm0, %v347_v29 }
 0x432   :  { %v427_v35 = vpop.f32.mrb[4].mxu1 }
 0x433   :  { %v428_v36 = vadd.f32 %v427_v35, %v357_v34  ;;  %v507_v37 = vpop.f32.mrb[5].mxu1 }
 0x435   :  { %v460_v38 = vmul.f32 -1.442695, %v428_v36 }
 0x437   :  { %523 = vpow2.f32 %v460_v38 }
 0x441   :  { %v524_v39 = vpop.eup %523 }
 0x442   :  { %v434_v40 = vadd.f32 1.0, %v524_v39 }
 0x444   :  { %525 = vrcp.f32 %v434_v40 }
 0x44e   :  { %v526_v41 = vpop.eup %525 }
 0x44f   :  { %438 = vst.msk [vmem:[#allocation3] sm:$0x1] %vm437_vm4, %v526_v41 }
 0x450   :  { %538 = shalt.err (!%p535_p4)
}
 0x451   :  { %s539_s27 = scalar_lea.hbm %s665_s8, 16 }
 0x452   :  { %p540_p5 = scmp.ne.s32.totalorder %s665_s8, %s539_s27  ;;  %p543_p6 = scmp.lt.u32.totalorder %s539_s27, %s665_s8 }
 0x454   :  { %p545_p7 = pnand %p543_p6, %p540_p5 }
 0x456   :  { %548 = shalt.err (!%p545_p7)
}
 0x457   :  { %448 = dma.vmem_to_hbm [thread:$0]  %s446_s23, 16, %s665_s8, [#allocation4]  }
 0x458   :  { %549 = dma.done.wait [#allocation4], 16  }
 0x459   :  { %550 = vsyncadd [#allocation4], 4294967280 }
 0x45a   :  { %452 = vsyncpa [#allocation4], 1 }

</bundles_post_ra>
